<compile_context>
chip_gen: v7x
topology: tpu7x:2x2x1
jax: 0.10.0
libtpu: 0.0.40
codegen_flags: <defaults>
</compile_context>

<pallas_src>
import functools

import jax
import jax.numpy as jnp
from jax import lax
from jax.experimental import pallas as pl
from jax.experimental.pallas import tpu as pltpu


def _ca_kernel(x_ref, w1t_ref, b1_ref, w2_ref, b2_ref, o_ref, acc_ref, *,
               inv_hw, hw_total, need_mask):
    # x_ref  : (1, C, hw_tile)  VMEM  current spatial slab of one batch element
    # w1t_ref: (C, Cr)          VMEM  first 1x1 conv weights, transposed
    # b1_ref : (1, Cr)          VMEM
    # w2_ref : (C, Cr)          VMEM  second 1x1 conv weights
    # b2_ref : (C, 1)           VMEM
    # o_ref  : (1, C, 1)        VMEM  output, written on the last HW step
    # acc_ref: (C, 128) f32     VMEM  lane-wide running spatial partial sums
    t = pl.program_id(1)
    C = acc_ref.shape[0]
    hw_tile = x_ref.shape[2]

    @pl.when(t == 0)
    def _():
        acc_ref[...] = jnp.zeros_like(acc_ref)

    if hw_tile % 128 != 0:
        # Tiny-spatial fallback (HW < 128): single narrow full-dim block; one XLU
        # lane-reduce into the first accumulator lane.  Runs once, negligible.
        acc_ref[:, :1] += jnp.sum(x_ref[0].astype(jnp.float32), axis=1, keepdims=True)
    else:
        # Streaming GAP hot loop: pure vld + VPU element-wise adds (no per-step XLU
        # reduce); the cross-lane reduce is deferred to the epilogue.
        K = hw_tile // 128
        base = t * hw_tile
        lane = lax.broadcasted_iota(jnp.int32, (C, 128), 1) if need_mask else None

        if K <= 16:
            for k in range(K):
                chunk = x_ref[0, :, k * 128:(k + 1) * 128].astype(jnp.float32)
                if need_mask:
                    chunk = jnp.where(base + k * 128 + lane < hw_total, chunk, 0.0)
                acc_ref[...] += chunk
        else:
            def add_chunk(k, carry):
                off = pl.multiple_of(k * 128, 128)
                chunk = x_ref[0, :, pl.ds(off, 128)].astype(jnp.float32)
                if need_mask:
                    chunk = jnp.where(base + off + lane < hw_total, chunk, 0.0)
                acc_ref[...] += chunk
                return carry

            lax.fori_loop(0, K, add_chunk, 0, unroll=8)

    @pl.when(t == pl.num_programs(1) - 1)
    def _():
        # Deferred cross-lane reduce + the two tiny 1x1 convs (once per sample).
        gap = jnp.sum(acc_ref[...], axis=1, keepdims=True) * inv_hw              # (C, 1)
        # FC1 + ReLU: h_j = relu(sum_c w1[j, c] * gap[c] + b1[j])               -> (1, Cr)
        h = jnp.sum(w1t_ref[...] * gap, axis=0, keepdims=True) + b1_ref[...]
        h = jnp.maximum(h, 0.0)
        # FC2: out_c = sum_j w2[c, j] * h[j] + b2[c]                            -> (C, 1)
        out = jnp.sum(w2_ref[...] * h, axis=1, keepdims=True) + b2_ref[...]
        o_ref[0] = out.astype(o_ref.dtype)


def _vmem_budget_bytes():
    """Scoped-VMEM budget: half of physical VMEM, capped at 64 MiB, floored at 24 MiB."""
    cap = 64 << 20
    try:
        cap = int(pltpu.get_tpu_info().vmem_capacity_bytes)
    except Exception:
        pass
    return max(24 << 20, min(cap // 2, 64 << 20))


def _pick_hw_tile(C, HW, itemsize, target_bytes):
    """Spatial tile (lane count) for the (1, C, hw_tile) x block.

    Always a multiple of 128 when HW >= 128 (lane-dense, uniform 128-lane chunks);
    falls back to the full (unpadded) HW only when HW < 128.  Tail coverage when the
    tile does not divide HW is handled with in-kernel masking.
    """
    if HW < 128:
        return HW
    lanes = max(128, (target_bytes // max(C * itemsize, 1)) // 128 * 128)
    hw_full = (HW // 128) * 128                       # largest multiple of 128 <= HW
    if HW % 128 == 0 and HW <= lanes:
        return HW                                     # single block, no masking
    tile = min(lanes, hw_full)
    if HW % 128 == 0:
        # Prefer an exact multiple-of-128 divisor close to the budget (avoids masking).
        t = tile
        while t >= 128 and HW % t != 0:
            t -= 128
        if t >= max(128, tile // 2):
            return t
    return tile                                       # cdiv grid; tail masked in-kernel


def channel_attention_n(x, w1, b1, w2, b2):
    """x: (N, C, H, W); w1: (Cr, C, 1, 1); b1: (Cr,); w2: (C, Cr, 1, 1); b2: (C,)."""
    N, C, H, W = x.shape
    Cr = w1.shape[0]
    HW = H * W

    x_flat = x.reshape(N, C, HW)                      # free view: HW on lanes

    itemsize = x.dtype.itemsize
    vmem_limit = _vmem_budget_bytes()
    target_bytes = vmem_limit // 4                    # double-buffered x blocks <= limit/2
    hw_tile = _pick_hw_tile(C, HW, itemsize, target_bytes)
    T = pl.cdiv(HW, hw_tile)
    need_mask = (HW % hw_tile) != 0

    w1t = w1.reshape(Cr, C).T.astype(jnp.float32)     # (C, Cr)
    w2m = w2.reshape(C, Cr).astype(jnp.float32)       # (C, Cr)
    b1r = b1.reshape(1, Cr).astype(jnp.float32)
    b2c = b2.reshape(C, 1).astype(jnp.float32)

    kernel = functools.partial(_ca_kernel, inv_hw=1.0 / HW, hw_total=HW,
                               need_mask=need_mask)

    cost = pl.CostEstimate(
        flops=int(N * C * HW + 4 * N * C * Cr),
        transcendentals=0,
        bytes_accessed=int(N * C * HW * itemsize
                           + (w1t.size + w2m.size + b1r.size + b2c.size) * 4
                           + N * C * itemsize),
    )

    out = pl.pallas_call(
        kernel,
        out_shape=jax.ShapeDtypeStruct((N, C, 1), x.dtype),
        grid_spec=pltpu.PrefetchScalarGridSpec(
            num_scalar_prefetch=0,
            grid=(N, T),
            in_specs=[
                pl.BlockSpec((1, C, hw_tile), lambda n, t: (n, 0, t)),
                pl.BlockSpec((C, Cr), lambda n, t: (0, 0)),
                pl.BlockSpec((1, Cr), lambda n, t: (0, 0)),
                pl.BlockSpec((C, Cr), lambda n, t: (0, 0)),
                pl.BlockSpec((C, 1), lambda n, t: (0, 0)),
            ],
            out_specs=pl.BlockSpec((1, C, 1), lambda n, t: (n, 0, 0)),
            scratch_shapes=[pltpu.VMEM((C, 128), jnp.float32)],
        ),
        compiler_params=pltpu.CompilerParams(
            dimension_semantics=("parallel", "arbitrary"),
            vmem_limit_bytes=vmem_limit,
        ),
        cost_estimate=cost,
    )(x_flat, w1t, b1r, w2m, b2c)

    return out.reshape(N, C, 1, 1)


def _reference(x, w1, b1, w2, b2):
    # Pure-JAX reference: GAP -> 1x1 conv -> ReLU -> 1x1 conv (same math as PyTorch).
    N, C, H, W = x.shape
    Cr = w1.shape[0]
    gap = jnp.mean(x, axis=(2, 3))                              # (N, C)
    h = jnp.maximum(gap @ w1.reshape(Cr, C).T + b1, 0.0)        # (N, Cr)
    out = h @ w2.reshape(C, Cr).T + b2                          # (N, C)
    return out.reshape(N, C, 1, 1)


if __name__ == "__main__":
    key = jax.random.PRNGKey(0)
    kx, k1, kb1, k2, kb2 = jax.random.split(key, 5)

    N, C, H, W = 2, 32, 16, 16
    reduction = 8
    Cr = C // reduction

    x = jax.random.normal(kx, (N, C, H, W), dtype=jnp.float32)

    # Deterministic Conv2d(C, C//r, 1) / Conv2d(C//r, C, 1) parameters (synthetic init).
    bound1 = 1.0 / (C ** 0.5)
    w1 = jax.random.uniform(k1, (Cr, C, 1, 1), jnp.float32, -bound1, bound1)
    b1 = jax.random.uniform(kb1, (Cr,), jnp.float32, -bound1, bound1)
    bound2 = 1.0 / (Cr ** 0.5)
    w2 = jax.random.uniform(k2, (C, Cr, 1, 1), jnp.float32, -bound2, bound2)
    b2 = jax.random.uniform(kb2, (C,), jnp.float32, -bound2, bound2)

    out = channel_attention_n(x, w1, b1, w2, b2)
    out = jax.block_until_ready(out)

    ref = _reference(x, w1, b1, w2, b2)
    assert out.shape == (N, C, 1, 1), out.shape
    assert jnp.allclose(out, ref, atol=1e-5, rtol=1e-5), float(
        jnp.max(jnp.abs(out - ref)))

    print("KERNEL_OK")
</pallas_src>

<mosaic_0001>
module attributes {stable_mosaic.version = 11 : i64} {
  func.func @_ca_kernel(%arg0: i32, %arg1: i32, %arg2: memref<1x32x256xf32, #tpu.memory_space<vmem>>, %arg3: memref<32x4xf32, #tpu.memory_space<vmem>>, %arg4: memref<1x4xf32, #tpu.memory_space<vmem>>, %arg5: memref<32x4xf32, #tpu.memory_space<vmem>>, %arg6: memref<32x1xf32, #tpu.memory_space<vmem>>, %arg7: memref<1x32x1xf32, #tpu.memory_space<vmem>>, %arg8: memref<32x128xf32, #tpu.memory_space<vmem>>) attributes {dimension_semantics = [#tpu.dimension_semantics<parallel>, #tpu.dimension_semantics<arbitrary>], iteration_bounds = array<i64: 2, 1>, scalar_prefetch = 0 : i64, scratch_operands = 1 : i64, tpu.core_type = #tpu.core_type<tc>, window_params = [{transform_indices = @transform_0, window_bounds = array<i64: 1, 32, 256>}, {pipeline_mode = #tpu.pipeline_mode<synchronous>, transform_indices = @transform_1, window_bounds = array<i64: 32, 4>}, {pipeline_mode = #tpu.pipeline_mode<synchronous>, transform_indices = @transform_2, window_bounds = array<i64: 1, 4>}, {pipeline_mode = #tpu.pipeline_mode<synchronous>, transform_indices = @transform_3, window_bounds = array<i64: 32, 4>}, {pipeline_mode = #tpu.pipeline_mode<synchronous>, transform_indices = @transform_4, window_bounds = array<i64: 32, 1>}, {transform_indices = @transform_5, window_bounds = array<i64: 1, 32, 1>}]} {
    %c0_i32 = arith.constant 0 : i32
    %0 = arith.cmpi eq, %arg1, %c0_i32 : i32
    %1 = arith.extui %0 : i1 to i32
    %c0_i32_0 = arith.constant 0 : i32
    %2 = arith.cmpi ne, %1, %c0_i32_0 : i32
    scf.if %2 {
      %cst = arith.constant 0.000000e+00 : f32
      %16 = vector.broadcast %cst : f32 to vector<32x128xf32>
      %c0_15 = arith.constant 0 : index
      %c0_16 = arith.constant 0 : index
      %17 = vector.load %arg8[%c0_15, %c0_16] : memref<32x128xf32, #tpu.memory_space<vmem>>, vector<32x128xf32>
      tpu.vector_store %arg8[%c0_15, %c0_16], %16 {strides = array<i32>} : memref<32x128xf32, #tpu.memory_space<vmem>>, vector<32x128xf32>,
    } else {
    }
    %c0 = arith.constant 0 : index
    %c0_1 = arith.constant 0 : index
    %c0_2 = arith.constant 0 : index
    %3 = vector.load %arg2[%c0, %c0_1, %c0_2] : memref<1x32x256xf32, #tpu.memory_space<vmem>>, vector<1x32x128xf32>
    %4 = vector.shape_cast %3 : vector<1x32x128xf32> to vector<32x128xf32>
    %c0_3 = arith.constant 0 : index
    %c0_4 = arith.constant 0 : index
    %5 = vector.load %arg8[%c0_3, %c0_4] : memref<32x128xf32, #tpu.memory_space<vmem>>, vector<32x128xf32>
    %6 = arith.addf %5, %4 : vector<32x128xf32>
    %c0_5 = arith.constant 0 : index
    %c0_6 = arith.constant 0 : index
    %7 = vector.load %arg8[%c0_5, %c0_6] : memref<32x128xf32, #tpu.memory_space<vmem>>, vector<32x128xf32>
    tpu.vector_store %arg8[%c0_5, %c0_6], %6 {strides = array<i32>} : memref<32x128xf32, #tpu.memory_space<vmem>>, vector<32x128xf32>,
    %c0_7 = arith.constant 0 : index
    %c0_8 = arith.constant 0 : index
    %c128 = arith.constant 128 : index
    %8 = vector.load %arg2[%c0_7, %c0_8, %c128] : memref<1x32x256xf32, #tpu.memory_space<vmem>>, vector<1x32x128xf32>
    %9 = vector.shape_cast %8 : vector<1x32x128xf32> to vector<32x128xf32>
    %c0_9 = arith.constant 0 : index
    %c0_10 = arith.constant 0 : index
    %10 = vector.load %arg8[%c0_9, %c0_10] : memref<32x128xf32, #tpu.memory_space<vmem>>, vector<32x128xf32>
    %11 = arith.addf %10, %9 : vector<32x128xf32>
    %c0_11 = arith.constant 0 : index
    %c0_12 = arith.constant 0 : index
    %12 = vector.load %arg8[%c0_11, %c0_12] : memref<32x128xf32, #tpu.memory_space<vmem>>, vector<32x128xf32>
    tpu.vector_store %arg8[%c0_11, %c0_12], %11 {strides = array<i32>} : memref<32x128xf32, #tpu.memory_space<vmem>>, vector<32x128xf32>,
    %c0_i32_13 = arith.constant 0 : i32
    %13 = arith.cmpi eq, %arg1, %c0_i32_13 : i32
    %14 = arith.extui %13 : i1 to i32
    %c0_i32_14 = arith.constant 0 : i32
    %15 = arith.cmpi ne, %14, %c0_i32_14 : i32
    scf.if %15 {
      %c0_15 = arith.constant 0 : index
      %c0_16 = arith.constant 0 : index
      %16 = vector.load %arg8[%c0_15, %c0_16] : memref<32x128xf32, #tpu.memory_space<vmem>>, vector<32x128xf32>
      %cst = arith.constant dense<0.000000e+00> : vector<32xf32>
      %17 = vector.multi_reduction <add>, %16, %cst [1] : vector<32x128xf32> to vector<32xf32>
      %18 = vector.shape_cast %17 : vector<32xf32> to vector<32x1xf32>
      %cst_17 = arith.constant 3.906250e-03 : f32
      %19 = vector.broadcast %cst_17 : f32 to vector<32x1xf32>
      %20 = arith.mulf %18, %19 : vector<32x1xf32>
      %c0_18 = arith.constant 0 : index
      %c0_19 = arith.constant 0 : index
      %21 = vector.load %arg3[%c0_18, %c0_19] : memref<32x4xf32, #tpu.memory_space<vmem>>, vector<32x4xf32>
      %22 = vector.broadcast %20 : vector<32x1xf32> to vector<32x4xf32>
      %23 = arith.mulf %21, %22 : vector<32x4xf32>
      %cst_20 = arith.constant dense<0.000000e+00> : vector<4xf32>
      %24 = vector.multi_reduction <add>, %23, %cst_20 [0] : vector<32x4xf32> to vector<4xf32>
      %25 = vector.shape_cast %24 : vector<4xf32> to vector<1x4xf32>
      %c0_21 = arith.constant 0 : index
      %c0_22 = arith.constant 0 : index
      %26 = vector.load %arg4[%c0_21, %c0_22] : memref<1x4xf32, #tpu.memory_space<vmem>>, vector<1x4xf32>
      %27 = arith.addf %25, %26 : vector<1x4xf32>
      %cst_23 = arith.constant 0.000000e+00 : f32
      %28 = vector.broadcast %cst_23 : f32 to vector<1x4xf32>
      %29 = arith.maximumf %27, %28 : vector<1x4xf32>
      %c0_24 = arith.constant 0 : index
      %c0_25 = arith.constant 0 : index
      %30 = vector.load %arg5[%c0_24, %c0_25] : memref<32x4xf32, #tpu.memory_space<vmem>>, vector<32x4xf32>
      %31 = vector.broadcast %29 : vector<1x4xf32> to vector<32x4xf32>
      %32 = arith.mulf %30, %31 : vector<32x4xf32>
      %cst_26 = arith.constant dense<0.000000e+00> : vector<32xf32>
      %33 = vector.multi_reduction <add>, %32, %cst_26 [1] : vector<32x4xf32> to vector<32xf32>
      %34 = vector.shape_cast %33 : vector<32xf32> to vector<32x1xf32>
      %c0_27 = arith.constant 0 : index
      %c0_28 = arith.constant 0 : index
      %35 = vector.load %arg6[%c0_27, %c0_28] : memref<32x1xf32, #tpu.memory_space<vmem>>, vector<32x1xf32>
      %36 = arith.addf %34, %35 : vector<32x1xf32>
      %c0_29 = arith.constant 0 : index
      %c0_30 = arith.constant 0 : index
      %c0_31 = arith.constant 0 : index
      %37 = vector.load %arg7[%c0_29, %c0_30, %c0_31] : memref<1x32x1xf32, #tpu.memory_space<vmem>>, vector<1x32x1xf32>
      %38 = vector.shape_cast %37 : vector<1x32x1xf32> to vector<32x1xf32>
      %39 = vector.shape_cast %36 : vector<32x1xf32> to vector<1x32x1xf32>
      tpu.vector_store %arg7[%c0_29, %c0_30, %c0_31], %39 {strides = array<i32>} : memref<1x32x1xf32, #tpu.memory_space<vmem>>, vector<1x32x1xf32>,
    } else {
    }
    return
  }
  func.func @transform_0(%arg0: i32, %arg1: i32) -> (i32, i32, i32) {
    %c0_i32 = arith.constant 0 : i32
    %c0_i32_0 = arith.constant 0 : i32
    return %arg0, %c0_i32, %arg1 : i32, i32, i32
  }
  func.func @transform_1(%arg0: i32, %arg1: i32) -> (i32, i32) {
    %c0_i32 = arith.constant 0 : i32
    %c0_i32_0 = arith.constant 0 : i32
    %c0_i32_1 = arith.constant 0 : i32
    return %c0_i32, %c0_i32_0 : i32, i32
  }
  func.func @transform_2(%arg0: i32, %arg1: i32) -> (i32, i32) {
    %c0_i32 = arith.constant 0 : i32
    %c0_i32_0 = arith.constant 0 : i32
    %c0_i32_1 = arith.constant 0 : i32
    return %c0_i32, %c0_i32_0 : i32, i32
  }
  func.func @transform_3(%arg0: i32, %arg1: i32) -> (i32, i32) {
    %c0_i32 = arith.constant 0 : i32
    %c0_i32_0 = arith.constant 0 : i32
    %c0_i32_1 = arith.constant 0 : i32
    return %c0_i32, %c0_i32_0 : i32, i32
  }
  func.func @transform_4(%arg0: i32, %arg1: i32) -> (i32, i32) {
    %c0_i32 = arith.constant 0 : i32
    %c0_i32_0 = arith.constant 0 : i32
    %c0_i32_1 = arith.constant 0 : i32
    return %c0_i32, %c0_i32_0 : i32, i32
  }
  func.func @transform_5(%arg0: i32, %arg1: i32) -> (i32, i32, i32) {
    %c0_i32 = arith.constant 0 : i32
    %c0_i32_0 = arith.constant 0 : i32
    %c0_i32_1 = arith.constant 0 : i32
    return %arg0, %c0_i32, %c0_i32_0 : i32, i32, i32
  }
}

</mosaic_0001>

<bundles_post_ra>
// kernel: tpu_custom_call.1
= control target key start
LH: loop header
LB: loop body
LE: loop exit
PB: predicated region body
PF: predicated region fallthrough
CT: control target
= control target key end

     0   :  { %10 = vsyncpa [#allocation4], 0  ;;  %s819_s0 = inlined_call_operand.hbm [shape: f32[2,32,256], index: 0, kind: input, shape index: {}]   ;;  %s820_s1 = inlined_call_operand.vmem [shape: f32[32,4], index: 1, kind: input, shape index: {}]   ;;  %s821_s2 = inlined_call_operand.vmem [shape: f32[1,4], index: 2, kind: input, shape index: {}]   ;;  %s822_s3 = inlined_call_operand.vmem [shape: f32[32,4], index: 3, kind: input, shape index: {}]   ;;  %s823_s4 = inlined_call_operand.vmem [shape: f32[32,1], index: 4, kind: input, shape index: {}]   ;;  %s824_s5 = inlined_call_operand.vmem [shape: f32[2,32,1], index: 5, kind: output, shape index: {}]  }
   0x1   :  { %12 = vsyncpa [#allocation4 + $0x1], 0  ;;  %s648_s18 = smov 0   ;;  %s650_s19 = smov 0  }
   0x2   :  { %s652_s20 = smov 0   ;;  %s654_s21 = smov 0  }
   0x3   :  { %s656_s22 = smov 0   ;;  %s658_s23 = smov 0  }
   0x4 LB: > { %s461_s24 = sadd.s32 4294967295, %s613_s23   ;;  %s30_s25 = sadd.s32 1, %s609_s22  ;;  %s613_s23 = sphi %s658_s23, %s18_s23   ;;  %s609_s22 = sphi %s656_s22, %s832_s22   ;;  %s605_s21 = sphi %s654_s21, %s831_s21   ;;  %s601_s20 = sphi %s652_s20, %s830_s20   ;;  %s597_s19 = sphi %s650_s19, %s829_s19   ;;  %s593_s18 = sphi %s648_s18, %s828_s18  }
   0x5   : > { %p32_p0 = scmp.ge.s32.totalorder %s30_s25, 2  ;;  %s39_s26 = sadd.s32 1, %s601_s20 }
   0x6   : > { %p46_p1 = scmp.ne.s32.totalorder %s601_s20, %s597_s19  ;;  %p47_p2 = scmp.eq.s32.totalorder %s613_s23, 0 }
   0x7   : > { %s834_s25 = smov (%p32_p0, %s30_s25), 0  ;;  %p52_p4 = scmp.ne.s32.totalorder %s597_s19, %s593_s18 }
   0x8   : > { %p684_p3 = por %p47_p2, %p46_p1  ;;  %s34_s28 = ssub.s32 %s609_s22, %s834_s25 }
   0x9   : > { %p53_p5 = scmp.eq.s32.totalorder %s461_s24, 0  ;;  %p37_p6 = scmp.eq.s32.totalorder %s34_s28, 0 }
   0xa   : > { %p482_p8 = scmp.lt.s32.totalorder %s613_s23, 2  ;;  %s198_s6 = sand.u32 1, %s601_s20  }
   0xb   : > { %p691_p7 = por %p53_p5, %p52_p4  ;;  %s474_s7 = sshll.u32 %s609_s22, 10 }
   0xc   : > { %s697_s30 = scalar_select %p37_p6, %s601_s20, %s39_s26  }
   0xd   : > { %s465_s8 = sshll.u32 %s198_s6, 6  ;;  %s704_s11 = scalar_lea.hbm %s819_s0, %s474_s7 }
   0xe   : > { %s202_s12 = scalar_lea.vmem [#allocation3], %s465_s8  ;;  %p708_p9 = pnand %p482_p8, %p684_p3 }
   0xf   : > { %s211_s13 = sshll.u32 %s202_s12, 4  ;;  %s714_s15 = scalar_lea.sflag [#allocation4], %s198_s6  ;;  %s712_s13 = int_to_ptr.vmem [resolvable:$true] %s211_s13 }
  0x10   : > { %s533_s16 = scalar_lea.hbm %s704_s11, 1024  ;;  %p535_p11 = pneg %p708_p9 }
  0x11   : > { %p534_p10 = scmp.ne.s32.totalorder %s704_s11, %s533_s16  ;;  %s538_s24 = scalar_lea.hbm %s819_s0, 2048 }
  0x12   : > { %p539_p0 = scmp.lt.u32.totalorder %s704_s11, %s819_s0  ;;  %p540_p1 = scmp.lt.u32.totalorder %s538_s24, %s533_s16 }
  0x13   : > { %p536_p12 = pnand %p535_p11, %p534_p10  ;;  %p542_p3 = scmp.lt.u32.totalorder %s533_s16, %s704_s11 }
  0x14   : > { %p541_p2 = por %p540_p1, %p539_p0 }
  0x15   : > { %p537_p13 = pneg %p536_p12 }
  0x16   : > { %p543_p4 = por %p542_p3, %p541_p2 }
  0x18   : > { %p544_p5 = pnand %p543_p4, %p537_p13 }
  0x1a   : > { %547 = shalt.err (!%p544_p5)
}
  0x1b   : > { %s548_s28 = scalar_lea.vmem %s712_s13, 1024  ;;  %s615_s6 = smov [#allocation3]  }
  0x1c   : > { %p549_p6 = scmp.ne.s32.totalorder %s712_s13, %s548_s28  ;;  %s553_s7 = sshll.u32 %s615_s6, 4  ;;  %s554_s7 = int_to_ptr.vmem [resolvable:$false] %s553_s7 }
  0x1d   : > { %s555_s8 = scalar_lea.vmem %s554_s7, 2048  ;;  %p556_p12 = scmp.lt.s32.totalorder %s712_s13, %s554_s7 }
  0x1e   : > { %p551_p8 = pnand %p549_p6, %p535_p11  ;;  %p557_p0 = scmp.lt.s32.totalorder %s555_s8, %s548_s28 }
  0x20   : > { %p552_p10 = pneg %p551_p8  ;;  %p558_p1 = por %p557_p0, %p556_p12 }
  0x22   : > { %p559_p2 = pnand %p558_p1, %p552_p10 }
  0x24   : > { %562 = shalt.err (!%p559_p2)
}
  0x25   : > { %s616_s9 = smov 256   ;;  %s617_s10 = smov 16  }
  0x26   : > { %481 = dma.hbm_to_vmem [thread:$0]  (!%p708_p9), %s704_s11, 1024, %s712_s13, %s714_s15, %s616_s9, %s616_s9, %s617_s10  }
  0x27   : > { %p468_p11 = scmp.ge.s32.totalorder %s613_s23, 1  ;;  %p219_p13 = scmp.lt.s32.totalorder %s613_s23, 3 }
  0x29   : > { %p220_p3 = pnand %p468_p11, %p219_p13 }
  0x2a   : > { %s225_s12 = sand.u32 (!%p220_p3), 1, %s597_s19  }
  0x2b   : > { %223 = sbr.rel (%p220_p3) target bundleno = 381 (0x17d), region = 40  ;;  %s469_s16 = sshll.u32 (!%p220_p3), %s225_s12, 6 }
  0x2c   : > { %s226_s17 = scalar_lea.sflag (!%p220_p3), [#allocation4], %s225_s12  ;;  %s229_s18 = scalar_lea.vmem (!%p220_p3), [#allocation3], %s469_s16 }
  0x32   : > { %588 = dma.done.wait (%p691_p7), %s226_s17, 1024  }
  0x33   : > { %590 = vsyncadd (%p691_p7), %s226_s17, 4294966272  ;;  %v270_v0 = vld [vmem:[%s229_s18] sm:$0xff]  ;;  %v286_v1 = vld [vmem:[%s229_s18 + $0x8] sm:$0xff]  ;;  %vm329_vm0 = vcmask 31744   ;;  %v350_v38 = vlaneseq  ;;  %p257_p7 = scmp.lt.s32.totalorder %s605_s21, 1  ;;  %vm378_vm1 = vcmask 7168  }
  0x34   : > { %v272_v2 = vld [vmem:[%s229_s18 + $0x20] sm:$0xff]  ;;  %v294_v3 = vadd.f32 %v286_v1, %v270_v0  ;;  %v288_v4 = vld [vmem:[%s229_s18 + $0x28] sm:$0xff]  ;;  %v271_v5 = vld [vmem:[%s229_s18 + $0x10] sm:$0xff] }
  0x35   : > { %v287_v6 = vld [vmem:[%s229_s18 + $0x18] sm:$0xff]  ;;  %v296_v7 = vadd.f32 %v288_v4, %v272_v2  ;;  %v273_v8 = vld [vmem:[%s229_s18 + $0x30] sm:$0xff]  ;;  %v321_v15 = vld [vmem:[%s820_s1] sm:$0xff]  ;;  %v351_v41 = vshrl.u32 %v350_v38, 7  ;;  %s836_s21 = smov (!%p257_p7, %s605_s21), 1 }
  0x36   : > { %v289_v9 = vld [vmem:[%s229_s18 + $0x38] sm:$0xff]  ;;  %309 = vadd.xlane.f32.xlu0 %v294_v3  ;;  %v295_v10 = vadd.f32 %v287_v6, %v271_v5  ;;  %v323_v17 = vld [vmem:[%s820_s1 + $0x10] sm:$0xff]  ;;  %v322_v18 = vld [vmem:[%s820_s1 + $0x8] sm:$0xff]  ;;  %s475_s29 = sshll.u32 %s836_s21, 5 }
  0x37   : > { %313 = vadd.xlane.f32.xlu1 %v296_v7  ;;  %v297_v11 = vadd.f32 %v289_v9, %v273_v8  ;;  %v324_v22 = vld [vmem:[%s820_s1 + $0x18] sm:$0xff]  ;;  %v343_v42 = vld [vmem:[%s821_s2] sm:$0x1]  ;;  %v352_v45 = vsub.s32 0, %v351_v41  ;;  %v347_v47 = vld [vmem:[%s822_s3 + $0x8] sm:$0xff]  ;;  %s261_s27 = scalar_lea.vmem %s824_s5, %s475_s29 }
  0x38   : > { %v346_v48 = vld [vmem:[%s822_s3] sm:$0xff]  ;;  %v349_v50 = vld [vmem:[%s822_s3 + $0x18] sm:$0xff]  ;;  %v348_v51 = vld [vmem:[%s822_s3 + $0x10] sm:$0xff] }
  0x39   : > { %v371_v60 = vld [vmem:[%s823_s4 + $0x8] sm:$0xff]  ;;  %v370_v61 = vld [vmem:[%s823_s4] sm:$0xff]  ;;  %v373_v2 = vld [vmem:[%s823_s4 + $0x18] sm:$0xff] }
  0x3a   : > { %311 = vadd.xlane.f32.xlu0 %v295_v10  ;;  %v372_v3 = vld [vmem:[%s823_s4 + $0x10] sm:$0xff] }
  0x3b   : > { %315 = vadd.xlane.f32.xlu1 %v297_v11 }
  0xc3   : > { %v310_v12 = vpop.xlane.xlu0 %309 }
  0xc4   : > { %v317_v13 = vmul.f32 0.00390625, %v310_v12  ;;  %v314_v14 = vpop.xlane.xlu1 %313 }
  0xc5   : > { %v319_v16 = vmul.f32 0.00390625, %v314_v14 }
  0xc6   : > { %v325_v20 = vmul.f32 %v321_v15, %v317_v13 }
  0xc7   : > { %v312_v19 = vpop.xlane.xlu0 %311  ;;  %v327_v25 = vmul.f32 %v323_v17, %v319_v16 }
  0xc8   : > { %v318_v21 = vmul.f32 0.00390625, %v312_v19  ;;  %v316_v23 = vpop.xlane.xlu1 %315  ;;  %v330_v28 = vsel %vm329_vm0, %v325_v20, 0.0 }
  0xc9   : > { %v320_v24 = vmul.f32 0.00390625, %v316_v23  ;;  %v333_v31 = vsel %vm329_vm0, %v327_v25, 0.0 }
  0xca   : > { %v326_v26 = vmul.f32 %v322_v18, %v318_v21 }
  0xcb   : > { %v328_v27 = vmul.f32 %v324_v22, %v320_v24 }
  0xcc   : > { %v331_v29 = vsel %vm329_vm0, %v326_v26, 0.0 }
  0xcd   : > { %v332_v30 = vadd.f32 %v331_v29, %v330_v28  ;;  %v335_v32 = vsel %vm329_vm0, %v328_v27, 0.0 }
  0xcf   : > { %v334_v33 = vadd.f32 %v333_v31, %v332_v30 }
  0xd1   : > { %v336_v34 = vadd.f32 %v335_v32, %v334_v33 }
  0xd3   : > { %v337_v35 = vrot.slane %v336_v34, 4 }
  0xd5   : > { %v338_v36 = vadd.f32 %v337_v35, %v336_v34 }
  0xd7   : > { %v339_v37 = vrot.slane %v338_v36, 2 }
  0xd9   : > { %v340_v39 = vadd.f32 %v339_v37, %v338_v36 }
  0xdb   : > { %v341_v40 = vrot.slane %v340_v39, 1 }
  0xdd   : > { %v342_v43 = vadd.f32 %v341_v40, %v340_v39 }
  0xdf   : > { %v344_v44 = vadd.f32 %v343_v42, %v342_v43 }
  0xe1   : > { %v345_v46 = vmax.f32 %v344_v44, 0.0 }
  0xe3   : > { %v353_v49 = vrot.slane %v345_v46, %v352_v45 }
  0xe5   : > { %v355_v52 = vmul.f32 %v353_v49, %v347_v47  ;;  %v354_v53 = vmul.f32 %v353_v49, %v346_v48  ;;  %v357_v56 = vmul.f32 %v353_v49, %v349_v50  ;;  %v356_v57 = vmul.f32 %v353_v49, %v348_v51 }
  0xe7   : > { %v361_v54 = vsel %vm329_vm0, %v355_v52, 0.0  ;;  %v358_v55 = vsel %vm329_vm0, %v354_v53, 0.0  ;;  %v367_v58 = vsel %vm329_vm0, %v357_v56, 0.0  ;;  %v364_v59 = vsel %vm329_vm0, %v356_v57, 0.0 }
  0xe8   : > { %362 = vadd.xlane.f32.xlu1 %v361_v54  ;;  %359 = vadd.xlane.f32.xlu0 %v358_v55 }
  0xec   : > { %368 = vadd.xlane.f32.xlu1 %v367_v58  ;;  %365 = vadd.xlane.f32.xlu0 %v364_v59 }
 0x175   : > { %v363_v62 = vpop.xlane.xlu1 %362  ;;  %v360_v63 = vpop.xlane.xlu0 %359 }
 0x176   : > { %v375_v0 = vadd.f32 %v371_v60, %v363_v62  ;;  %v374_v1 = vadd.f32 %v370_v61, %v360_v63 }
 0x178   : > { %380 = vst.msk [vmem:[%s261_s27 + $0x8] sm:$0xff] %vm378_vm1, %v375_v0  ;;  %379 = vst.msk [vmem:[%s261_s27] sm:$0xff] %vm378_vm1, %v374_v1 }
 0x179   : > { %v369_v4 = vpop.xlane.xlu1 %368  ;;  %v366_v5 = vpop.xlane.xlu0 %365 }
 0x17a   : > { %v377_v6 = vadd.f32 %v373_v2, %v369_v4  ;;  %v376_v7 = vadd.f32 %v372_v3, %v366_v5 }
 0x17c   : > { %382 = vst.msk [vmem:[%s261_s27 + $0x18] sm:$0xff] %vm378_vm1, %v377_v6  ;;  %381 = vst.msk [vmem:[%s261_s27 + $0x10] sm:$0xff] %vm378_vm1, %v376_v7 }
 0x17d PF: > { %s18_s23 = sadd.s32 1, %s613_s23   ;;  %s828_s18 = smov %s597_s19 }
 0x17e   : > { %p15_p9 = scmp.ge.s32.totalorder %s18_s23, 4   ;;  %s829_s19 = smov %s601_s20 }
 0x17f   : > { %s830_s20 = smov %s697_s30  ;;  %s831_s21 = smov %s609_s22 }
 0x180   : > { %s832_s22 = smov %s834_s25  ;;  %17 = sbr.rel (!%p15_p9) target bundleno = 4 (0x4), region = 88 }
 0x187   :  { %404 = vsyncpa [#allocation4], 1 }
 0x188   :  { %406 = vsyncpa [#allocation4 + $0x1], 1 }

</bundles_post_ra>
